<compile_context>
chip_gen: v7x
topology: tpu7x:2x2x1
jax: 0.10.0
libtpu: 0.0.40
codegen_flags: <defaults>
</compile_context>

<pallas_src>
import jax
import jax.numpy as jnp
from jax.experimental import pallas as pl
from jax.experimental.pallas import tpu as pltpu


def _round_up(x, m):
    return ((x + m - 1) // m) * m


def _cdiv(a, b):
    return -(-a // b)


def _mlp_softmax_kernel(obs_ref, w1_ref, b1_ref, w2_ref, b2_ref, out_ref):
    # obs_ref: (TILE_B, obs_dim)  w1_ref: (obs_dim, hid)  b1_ref: (1, hid)
    # w2_ref:  (hid, act_dim)     b2_ref: (1, act_dim)    out_ref: (TILE_B, act_dim)
    x = obs_ref[...]

    # fc1 + tanh (tanh lowers to the EUP); accumulate in f32.
    h = jnp.dot(x, w1_ref[...], preferred_element_type=jnp.float32)
    h = jnp.tanh(h + b1_ref[...])

    # fc2; cast activations to the weight dtype so the MXU takes its native path.
    logits = jnp.dot(h.astype(w2_ref.dtype), w2_ref[...],
                     preferred_element_type=jnp.float32)
    logits = logits + b2_ref[...]

    # Numerically-stable softmax in f32; exact divide so probs sum to 1 exactly.
    m = jnp.max(logits, axis=-1, keepdims=True)
    e = jnp.exp(logits - m)
    denom = jnp.sum(e, axis=-1, keepdims=True)
    out_ref[...] = (e / denom).astype(out_ref.dtype)


def prepare_params(w1, b1, w2, b2, compute_dtype=jnp.bfloat16):
    """One-time shaping/casting so the hot path only passes pre-shaped arrays."""
    return (jnp.asarray(w1, compute_dtype),
            jnp.asarray(b1, jnp.float32).reshape(1, -1),
            jnp.asarray(w2, compute_dtype),
            jnp.asarray(b2, jnp.float32).reshape(1, -1))


def _choose_tile_b(B, tile_b_max):
    tile_b_max = max(8, _round_up(tile_b_max, 8))
    n_tiles = max(1, _cdiv(B, tile_b_max))
    # Keep >= 2 grid steps for medium/large batches so v7x's second TensorCore
    # shares the batch axis (no effect on single-TC v5e/v6e).
    if B > 16 and n_tiles < 2:
        n_tiles = 2
    return _round_up(_cdiv(B, n_tiles), 8)


def policy_forward(obs, w1, b1_2d, w2, b2_2d, *, tile_b_max=2048):
    """obs: (B, obs_dim); params pre-shaped/cast by prepare_params()."""
    B, obs_dim = obs.shape
    hid = w1.shape[1]
    act_dim = w2.shape[1]

    obs = obs.astype(w1.dtype)

    # Batch tiling: <= 7 rows of padding, >= 2 steps when B > 16.
    tile_b = _choose_tile_b(B, tile_b_max)
    b_pad = _round_up(B, tile_b)
    if b_pad != B:
        obs = jnp.pad(obs, ((0, b_pad - B), (0, 0)))
    grid = (b_pad // tile_b,)

    in_bytes = jnp.dtype(w1.dtype).itemsize
    cost = pl.CostEstimate(
        flops=2 * b_pad * (obs_dim * hid + hid * act_dim),
        transcendentals=b_pad * (hid + act_dim),
        bytes_accessed=(in_bytes * (b_pad * obs_dim + obs_dim * hid + hid * act_dim)
                        + 4 * (b_pad * act_dim + hid + act_dim)),
    )

    out = pl.pallas_call(
        _mlp_softmax_kernel,
        out_shape=jax.ShapeDtypeStruct((b_pad, act_dim), jnp.float32),
        grid=grid,
        in_specs=[
            # obs: streamed batch tiles (double-buffered by the pipeliner)
            pl.BlockSpec((tile_b, obs_dim), lambda i: (i, 0)),
            # weights / biases: constant index map -> VMEM-resident, single DMA
            pl.BlockSpec((obs_dim, hid), lambda i: (0, 0)),
            pl.BlockSpec((1, hid), lambda i: (0, 0)),
            pl.BlockSpec((hid, act_dim), lambda i: (0, 0)),
            pl.BlockSpec((1, act_dim), lambda i: (0, 0)),
        ],
        # Store only the real act_dim columns (tiny masked vst beats a 32x
        # inflated 128-lane writeback for this HBM-bound kernel).
        out_specs=pl.BlockSpec((tile_b, act_dim), lambda i: (i, 0)),
        compiler_params=pltpu.CompilerParams(
            dimension_semantics=("parallel",),
        ),
        cost_estimate=cost,
    )(obs, w1, b1_2d, w2, b2_2d)

    return out[:B]


def init_params(key, obs_dim, act_dim):
    """Deterministic init mimicking PyTorch Linear default (uniform +-1/sqrt(fan_in))."""
    hid = act_dim * 10
    k1, k2, k3, k4 = jax.random.split(key, 4)
    bound1 = 1.0 / jnp.sqrt(obs_dim)
    bound2 = 1.0 / jnp.sqrt(hid)
    # Stored already transposed: (in, out)
    w1 = jax.random.uniform(k1, (obs_dim, hid), jnp.float32, -bound1, bound1)
    b1 = jax.random.uniform(k2, (hid,), jnp.float32, -bound1, bound1)
    w2 = jax.random.uniform(k3, (hid, act_dim), jnp.float32, -bound2, bound2)
    b2 = jax.random.uniform(k4, (act_dim,), jnp.float32, -bound2, bound2)
    return w1, b1, w2, b2


def _reference(obs, w1, b1, w2, b2):
    h = jnp.tanh(obs @ w1 + b1)
    return jax.nn.softmax(h @ w2 + b2, axis=-1)


if __name__ == "__main__":
    key = jax.random.PRNGKey(0)
    obs_dim, act_dim = 32, 4

    k_params, k_obs_small, k_obs_big = jax.random.split(key, 3)
    w1, b1, w2, b2 = init_params(k_params, obs_dim, act_dim)

    # One-time parameter shaping/casting, kept out of the per-call hot path.
    params_f32 = prepare_params(w1, b1, w2, b2, jnp.float32)
    params_bf16 = prepare_params(w1, b1, w2, b2, jnp.bfloat16)

    # Small batch (typical single-step RL inference), exact f32 path.
    batch = 8
    obs = jax.random.normal(k_obs_small, (batch, obs_dim), jnp.float32)
    prob = policy_forward(obs, *params_f32)
    jax.block_until_ready(prob)

    ref = _reference(obs, w1, b1, w2, b2)
    assert prob.shape == (batch, act_dim)
    assert jnp.allclose(prob, ref, atol=2e-3, rtol=2e-3)
    assert jnp.allclose(jnp.sum(prob, axis=-1), 1.0, atol=1e-5)

    # Non-multiple batch: exercises tiling (2 tiles of 304, 8 padded rows)
    # and the bf16 input-streaming path.
    batch_big = 600
    obs_big = jax.random.normal(k_obs_big, (batch_big, obs_dim), jnp.float32)
    prob_big = policy_forward(obs_big, *params_bf16)
    jax.block_until_ready(prob_big)

    ref_big = _reference(obs_big, w1, b1, w2, b2)
    assert prob_big.shape == (batch_big, act_dim)
    assert jnp.allclose(prob_big, ref_big, atol=2e-2, rtol=2e-2)
    assert jnp.allclose(jnp.sum(prob_big, axis=-1), 1.0, atol=1e-5)

    print("KERNEL_OK")
</pallas_src>

<mosaic_0001>
module attributes {stable_mosaic.version = 11 : i64} {
  func.func @_mlp_softmax_kernel(%arg0: i32, %arg1: memref<8x32xf32, #tpu.memory_space<vmem>>, %arg2: memref<32x40xf32, #tpu.memory_space<vmem>>, %arg3: memref<1x40xf32, #tpu.memory_space<vmem>>, %arg4: memref<40x4xf32, #tpu.memory_space<vmem>>, %arg5: memref<1x4xf32, #tpu.memory_space<vmem>>, %arg6: memref<8x4xf32, #tpu.memory_space<vmem>>) attributes {dimension_semantics = [#tpu.dimension_semantics<parallel>], iteration_bounds = array<i64: 1>, scalar_prefetch = 0 : i64, scratch_operands = 0 : i64, tpu.core_type = #tpu.core_type<tc>, window_params = [{transform_indices = @transform_0, window_bounds = array<i64: 8, 32>}, {pipeline_mode = #tpu.pipeline_mode<synchronous>, transform_indices = @transform_1, window_bounds = array<i64: 32, 40>}, {pipeline_mode = #tpu.pipeline_mode<synchronous>, transform_indices = @transform_2, window_bounds = array<i64: 1, 40>}, {pipeline_mode = #tpu.pipeline_mode<synchronous>, transform_indices = @transform_3, window_bounds = array<i64: 40, 4>}, {pipeline_mode = #tpu.pipeline_mode<synchronous>, transform_indices = @transform_4, window_bounds = array<i64: 1, 4>}, {transform_indices = @transform_5, window_bounds = array<i64: 8, 4>}]} {
    %c0 = arith.constant 0 : index
    %c0_0 = arith.constant 0 : index
    %0 = vector.load %arg1[%c0, %c0_0] : memref<8x32xf32, #tpu.memory_space<vmem>>, vector<8x32xf32>
    %c0_1 = arith.constant 0 : index
    %c0_2 = arith.constant 0 : index
    %1 = vector.load %arg2[%c0_1, %c0_2] : memref<32x40xf32, #tpu.memory_space<vmem>>, vector<32x40xf32>
    %cst = arith.constant dense<0.000000e+00> : vector<8x40xf32>
    %2 = tpu.matmul %0, %1, %cst {dimension_numbers = #tpu.dot_dimension_numbers<[1], [0], [0], [1], [0, 0, 1, 1], [], []>} : vector<8x32xf32>, vector<32x40xf32>, vector<8x40xf32> -> vector<8x40xf32>
    %c0_3 = arith.constant 0 : index
    %c0_4 = arith.constant 0 : index
    %3 = vector.load %arg3[%c0_3, %c0_4] : memref<1x40xf32, #tpu.memory_space<vmem>>, vector<1x40xf32>
    %4 = vector.broadcast %3 : vector<1x40xf32> to vector<8x40xf32>
    %5 = arith.addf %2, %4 : vector<8x40xf32>
    %6 = math.tanh %5 : vector<8x40xf32>
    %c0_5 = arith.constant 0 : index
    %c0_6 = arith.constant 0 : index
    %7 = vector.load %arg4[%c0_5, %c0_6] : memref<40x4xf32, #tpu.memory_space<vmem>>, vector<40x4xf32>
    %cst_7 = arith.constant dense<0.000000e+00> : vector<8x4xf32>
    %8 = tpu.matmul %6, %7, %cst_7 {dimension_numbers = #tpu.dot_dimension_numbers<[1], [0], [0], [1], [0, 0, 1, 1], [], []>} : vector<8x40xf32>, vector<40x4xf32>, vector<8x4xf32> -> vector<8x4xf32>
    %c0_8 = arith.constant 0 : index
    %c0_9 = arith.constant 0 : index
    %9 = vector.load %arg5[%c0_8, %c0_9] : memref<1x4xf32, #tpu.memory_space<vmem>>, vector<1x4xf32>
    %10 = vector.broadcast %9 : vector<1x4xf32> to vector<8x4xf32>
    %11 = arith.addf %8, %10 : vector<8x4xf32>
    %cst_10 = arith.constant dense<0xFF800000> : vector<8xf32>
    %12 = vector.multi_reduction <maximumf>, %11, %cst_10 [1] : vector<8x4xf32> to vector<8xf32>
    %13 = vector.shape_cast %12 : vector<8xf32> to vector<8x1xf32>
    %14 = vector.broadcast %13 : vector<8x1xf32> to vector<8x4xf32>
    %15 = arith.subf %11, %14 : vector<8x4xf32>
    %16 = math.exp %15 : vector<8x4xf32>
    %cst_11 = arith.constant dense<0.000000e+00> : vector<8xf32>
    %17 = vector.multi_reduction <add>, %16, %cst_11 [1] : vector<8x4xf32> to vector<8xf32>
    %18 = vector.shape_cast %17 : vector<8xf32> to vector<8x1xf32>
    %19 = vector.broadcast %18 : vector<8x1xf32> to vector<8x4xf32>
    %20 = arith.divf %16, %19 : vector<8x4xf32>
    %c0_12 = arith.constant 0 : index
    %c0_13 = arith.constant 0 : index
    %21 = vector.load %arg6[%c0_12, %c0_13] : memref<8x4xf32, #tpu.memory_space<vmem>>, vector<8x4xf32>
    tpu.vector_store %arg6[%c0_12, %c0_13], %20 {strides = array<i32>} : memref<8x4xf32, #tpu.memory_space<vmem>>, vector<8x4xf32>,
    return
  }
  func.func @transform_0(%arg0: i32) -> (i32, i32) {
    %c0_i32 = arith.constant 0 : i32
    %c0_i32_0 = arith.constant 0 : i32
    return %arg0, %c0_i32 : i32, i32
  }
  func.func @transform_1(%arg0: i32) -> (i32, i32) {
    %c0_i32 = arith.constant 0 : i32
    %c0_i32_0 = arith.constant 0 : i32
    %c0_i32_1 = arith.constant 0 : i32
    return %c0_i32, %c0_i32_0 : i32, i32
  }
  func.func @transform_2(%arg0: i32) -> (i32, i32) {
    %c0_i32 = arith.constant 0 : i32
    %c0_i32_0 = arith.constant 0 : i32
    %c0_i32_1 = arith.constant 0 : i32
    return %c0_i32, %c0_i32_0 : i32, i32
  }
  func.func @transform_3(%arg0: i32) -> (i32, i32) {
    %c0_i32 = arith.constant 0 : i32
    %c0_i32_0 = arith.constant 0 : i32
    %c0_i32_1 = arith.constant 0 : i32
    return %c0_i32, %c0_i32_0 : i32, i32
  }
  func.func @transform_4(%arg0: i32) -> (i32, i32) {
    %c0_i32 = arith.constant 0 : i32
    %c0_i32_0 = arith.constant 0 : i32
    %c0_i32_1 = arith.constant 0 : i32
    return %c0_i32, %c0_i32_0 : i32, i32
  }
  func.func @transform_5(%arg0: i32) -> (i32, i32) {
    %c0_i32 = arith.constant 0 : i32
    %c0_i32_0 = arith.constant 0 : i32
    return %arg0, %c0_i32 : i32, i32
  }
}

</mosaic_0001>

<bundles_post_ra>
// kernel: tpu_custom_call.1
= control target key start
LH: loop header
LB: loop body
LE: loop exit
PB: predicated region body
PF: predicated region fallthrough
CT: control target
= control target key end

     0   :  { %v270_v0 = vmov 0.0|0.0   ;;  %vm271_vm0 = vmmov 0   ;;  %v272_v4 = vmov 0.0   ;;  %vm32_vm1 = vcmask 261120   ;;  %s345_s1 = inlined_call_operand.vmem [shape: f32[32,40], index: 1, kind: input, shape index: {}]   ;;  %s346_s0 = inlined_call_operand.vmem [shape: f32[8,32], index: 0, kind: input, shape index: {}]   ;;  %s347_s3 = inlined_call_operand.vmem [shape: f32[40,4], index: 3, kind: input, shape index: {}]   ;;  %s348_s2 = inlined_call_operand.vmem [shape: f32[1,40], index: 2, kind: input, shape index: {}]   ;;  %s349_s4 = inlined_call_operand.vmem [shape: f32[1,4], index: 4, kind: input, shape index: {}]   ;;  %s350_s5 = inlined_call_operand.vmem [shape: f32[8,4], index: 5, kind: output, shape index: {}]  }
   0x1   :  { %249 = vmatprep.subr.bf16.mxu0 %v270_v0  ;;  %v21_v1 = vld [vmem:[%s345_s1] sm:$0xff]  ;;  %v22_v2 = vld [vmem:[%s345_s1 + $0x8] sm:$0xff]  ;;  %v23_v3 = vld [vmem:[%s345_s1 + $0x10] sm:$0xff]  ;;  %233 = vmatprep.mubr.msk.f32.mxu0 %vm271_vm0, %v272_v4  ;;  %vm119_vm2 = vcmask 326656   ;;  %vm193_vm3 = vcmask 31744  }
   0x2   :  { %v250_v5 = vpack.c.bf16 %v22_v2, %v21_v1  ;;  %v24_v6 = vld [vmem:[%s345_s1 + $0x18] sm:$0xff]  ;;  %255 = vmatprep.subr.bf16.mxu1 %v270_v0  ;;  %246 = vmatprep.mubr.msk.f32.mxu1 %vm271_vm0, %v272_v4  ;;  %v20_v8 = vld [vmem:[%s346_s0] sm:$0xff]  ;;  %v108_v10 = vld [vmem:[%s347_s3 + $0x8] sm:$0xff] }
   0x3   :  { %v253_v7 = vpack.c.bf16 %v24_v6, %v23_v3  ;;  %v107_v9 = vld [vmem:[%s347_s3] sm:$0xff]  ;;  %v109_v12 = vld [vmem:[%s347_s3 + $0x10] sm:$0xff]  ;;  %v110_v13 = vld [vmem:[%s347_s3 + $0x18] sm:$0xff] }
   0x4   :  { %251 = vmatpush3.bf16.msra.mxu0 %v250_v5  ;;  %v256_v11 = vpack.c.bf16 %v108_v10, %v107_v9  ;;  %v259_v14 = vpack.c.bf16 %v110_v13, %v109_v12  ;;  %v111_v15 = vld [vmem:[%s347_s3 + $0x20] sm:$0xff] }
   0x5   :  { %252 = vmatprep.subr.bf16.mxu0 %v270_v0  ;;  %v210_v16 = vld [vmem:[%s348_s2] ss:$0 sm:$0xff] }
   0x6   :  { %257 = vmatpush3.bf16.msra.mxu1 %v256_v11  ;;  %v212_v21 = vld [vmem:[%s349_s4] ss:$0 sm:$0xff] }
   0x7   :  { %258 = vmatprep.subr.bf16.mxu1 %v270_v0 }
   0x8   :  { %254 = vmatpush3.bf16.msra.mxu0 %v253_v7 }
   0xa   :  { %260 = vmatpush3.bf16.msra.mxu1 %v259_v14 }
   0xb   :  { %234 = vmatmul.mubr.msk.f32.vlgmr.msra.gmra.mrb[0].mxu0 %vm32_vm1, %v20_v8  ;;  %244 = vmatprep.subr.mxu1 %v272_v4 }
   0xe   :  { %245 = vmatpush3.msra.mxu1 %v111_v15 }
  0xde   :  { %v102_v17 = vpop.f32.mrb[0].mxu0 }
  0xdf   :  { %v103_v18 = vadd.f32 %v210_v16, %v102_v17  ;;  %v235_v19 = vpop.f32.mrb[1].mxu0 }
  0xe1   :  { %264 = vtanh.f32 %v103_v18 }
  0xeb   :  { %v265_v20 = vpop.eup %264 }
  0xec   :  { %247 = vmatmul.mubr.msk.f32.vlgmr.msra.gmra.mrb[0].mxu1 %vm119_vm2, %v265_v20 }
 0x1bf   :  { %v189_v22 = vpop.f32.mrb[0].mxu1 }
 0x1c0   :  { %v190_v23 = vadd.f32 %v212_v21, %v189_v22  ;;  %v248_v24 = vpop.f32.mrb[1].mxu1 }
 0x1c2   :  { %v194_v25 = vsel %vm193_vm3, %v190_v23, -inf }
 0x1c3   :  { %195 = vmax.xlane.f32.xlu0 %v194_v25 }
 0x250   :  { %v196_v26 = vpop.xlane.xlu0 %195 }
 0x251   :  { %v197_v27 = vsub.f32 %v190_v23, %v196_v26 }
 0x253   :  { %v198_v28 = vmul.f32 1.442695, %v197_v27 }
 0x255   :  { %266 = vpow2.f32 %v198_v28 }
 0x25f   :  { %v267_v29 = vpop.eup %266 }
 0x260   :  { %v200_v30 = vsel %vm193_vm3, %v267_v29, 0.0 }
 0x261   :  { %201 = vadd.xlane.f32.xlu0 %v200_v30 }
 0x2ee   :  { %v202_v31 = vpop.xlane.xlu0 %201 }
 0x2ef   :  { %268 = vrcp.f32 %v202_v31 }
 0x2f9   :  { %v269_v32 = vpop.eup %268 }
 0x2fa   :  { %v204_v33 = vmul.f32 %v269_v32, %v267_v29 }
 0x2fc   :  { %205 = vst.msk [vmem:[%s350_s5] sm:$0xff] %vm193_vm3, %v204_v33 }

</bundles_post_ra>
